<compile_context>
chip_gen: v7x
topology: tpu7x:2x2x1
jax: 0.10.0
libtpu: 0.0.40
codegen_flags: <defaults>
</compile_context>

<pallas_src>
import jax
import jax.numpy as jnp
from jax.experimental import pallas as pl
from jax.experimental.pallas import tpu as pltpu


# 48 MiB: comfortably under v7x's 64 MiB physical VMEM per TensorCore and well
# under v5e/v6e's 128 MiB.  The per-step working set is
#   2 * N*D*4 B (scratch)  +  N*D*2 B (x)  +  double-buffered edge tiles
#   (E_TILE * (2*D + 4 + 4) B)  +  per-layer weights (~6*D*D*2 B),
# which for E_TILE=128..1024 and D up to ~512 stays far below this limit.
_VMEM_LIMIT_BYTES = 48 * 1024 * 1024


# ----------------------------------------------------------------------------- #
# Fused all-layer GINE kernel: per (layer, edge-block) grid step
#   gather -> message ReLU -> scatter-add accumulate ; finalize layer with
#   eps-residual + (BN-folded) MLP + k-hop residual, all resident in VMEM.
# ----------------------------------------------------------------------------- #
def _fused_gine_kernel(
    x_ref,        # (N, D)        bf16  initial node features (read once)
    src_ref,      # (E_TILE, 1)   int32 source node index per edge (sentinel = N for pad)
    dst_ref,      # (1, E_TILE)   int32 target node index per edge (sentinel = N for pad)
    ea_ref,       # (E_TILE, D)   bf16  edge features
    w_lin_ref,    # (1, D, D)     bf16  GINEConv.lin weight (in, out)
    b_lin_ref,    # (1, 1, D)     f32
    w1_ref,       # (1, D, 2D)    bf16  MLP linear 1, BatchNorm folded in
    b1_ref,       # (1, 1, 2D)    f32   bias with BatchNorm folded in
    w2_ref,       # (1, 2D, D)    bf16  MLP linear 2
    b2_ref,       # (1, 1, D)     f32
    eps_ref,      # (L, 1)        f32   SMEM: GINEConv eps per layer
    o_ref,        # (N, D)        f32   output (written on the last grid step)
    h_scr,        # (N, D)        f32   VMEM scratch: node state carried across layers
    agg_scr,      # (N, D)        f32   VMEM scratch: per-layer message accumulator
):
    layer = pl.program_id(0)
    eb = pl.program_id(1)
    n_layers = pl.num_programs(0)
    n_eb = pl.num_programs(1)
    n_nodes = x_ref.shape[0]
    e_tile = ea_ref.shape[0]

    # Initialize node state from the input on the very first grid step.
    @pl.when(jnp.logical_and(layer == 0, eb == 0))
    def _init_nodes():
        h_scr[...] = x_ref[...].astype(jnp.float32)

    # Zero the aggregation accumulator at the start of every layer.
    @pl.when(eb == 0)
    def _zero_acc():
        agg_scr[...] = jnp.zeros_like(agg_scr)

    h_bf = h_scr[...].astype(jnp.bfloat16)

    # Edge-feature projection for this edge block (GINEConv.lin), bf16 on MXU.
    e_proj = (
        jnp.dot(ea_ref[...], w_lin_ref[0], preferred_element_type=jnp.float32)
        + b_lin_ref[0]
    )

    # Gather source-node features: in-kernel bf16 one-hot (exact 0/1 weights),
    # built from the int32 index vector -- no (E, N) operand ever touches HBM.
    src = src_ref[...]                                                 # (E_TILE, 1)
    gather_oh = jnp.where(
        src == jax.lax.broadcasted_iota(jnp.int32, (e_tile, n_nodes), 1),
        1.0, 0.0).astype(jnp.bfloat16)                                 # (E_TILE, N)
    x_src = jnp.dot(gather_oh, h_bf, preferred_element_type=jnp.float32)

    # Messages + ReLU, then scatter-add to target nodes (f32 accumulator).
    msg = jnp.maximum(x_src + e_proj, 0.0).astype(jnp.bfloat16)        # (E_TILE, D)
    dst = dst_ref[...]                                                 # (1, E_TILE)
    scatter_oh = jnp.where(
        jax.lax.broadcasted_iota(jnp.int32, (n_nodes, e_tile), 0) == dst,
        1.0, 0.0).astype(jnp.bfloat16)                                 # (N, E_TILE)
    agg_scr[...] += jnp.dot(scatter_oh, msg, preferred_element_type=jnp.float32)

    # Finalize the layer once all edge blocks have been accumulated.
    @pl.when(eb == n_eb - 1)
    def _finalize_layer():
        h = h_scr[...]
        eps = eps_ref[layer, 0]
        center = agg_scr[...] + (1.0 + eps) * h
        # MLP: Linear(D->2D) [BatchNorm folded] -> ReLU -> Linear(2D->D).
        z = jnp.dot(center.astype(jnp.bfloat16), w1_ref[0],
                    preferred_element_type=jnp.float32) + b1_ref[0]
        z = jnp.maximum(z, 0.0)
        out = jnp.dot(z.astype(jnp.bfloat16), w2_ref[0],
                      preferred_element_type=jnp.float32) + b2_ref[0]
        # StructureExtractor residual: h = gnn[l](h) + h   for l >= 1.
        gate = jnp.where(layer > 0, 1.0, 0.0)
        h_scr[...] = out + gate * h

    @pl.when(jnp.logical_and(layer == n_layers - 1, eb == n_eb - 1))
    def _write_output():
        o_ref[...] = h_scr[...].astype(o_ref.dtype)


# ----------------------------------------------------------------------------- #
# Host-side parameter prep: stack per-layer params, fold eval-mode BatchNorm
# into the first MLP linear, cast matmul operands to bf16.
# ----------------------------------------------------------------------------- #
def stack_and_fold_params(layer_params):
    def stack(key):
        return jnp.stack([p[key] for p in layer_params], axis=0)

    w1 = stack("w1")                      # (L, D, 2D)
    b1 = stack("b1")                      # (L, 1, 2D)
    bn_scale = stack("bn_scale")          # (L, 1, 2D)
    bn_shift = stack("bn_shift")          # (L, 1, 2D)
    w1_folded = w1 * bn_scale             # fold BN scale into the weight
    b1_folded = b1 * bn_scale + bn_shift  # fold BN shift into the bias
    eps = jnp.concatenate([p["eps"].reshape(1, 1) for p in layer_params], axis=0)

    return {
        "w_lin": stack("w_lin").astype(jnp.bfloat16),   # (L, D, D)
        "b_lin": stack("b_lin").astype(jnp.float32),    # (L, 1, D)
        "w1": w1_folded.astype(jnp.bfloat16),            # (L, D, 2D)
        "b1": b1_folded.astype(jnp.float32),             # (L, 1, 2D)
        "w2": stack("w2").astype(jnp.bfloat16),          # (L, 2D, D)
        "b2": stack("b2").astype(jnp.float32),           # (L, 1, D)
        "eps": eps.astype(jnp.float32),                  # (L, 1)
    }


# ----------------------------------------------------------------------------- #
# StructureExtractor forward: one fused pallas_call for all k_hop layers.
# ----------------------------------------------------------------------------- #
def structure_extractor_forward(x, edge_index, edge_attr, stacked_params,
                                pos_encoding=None, *, edge_tile=128):
    N, D = x.shape
    E = edge_index.shape[1]
    L = stacked_params["w_lin"].shape[0]
    H = stacked_params["w1"].shape[2]          # 2 * D

    # Pad the edge list to a multiple of the edge tile.  Padded edges use the
    # sentinel index N which matches no node (iota runs 0..N-1), so they
    # contribute nothing -- same semantics as segment_sum dropping OOB indices.
    e_pad = ((E + edge_tile - 1) // edge_tile) * edge_tile
    num_eb = e_pad // edge_tile
    src = jnp.full((e_pad,), N, jnp.int32).at[:E].set(edge_index[0].astype(jnp.int32))
    dst = jnp.full((e_pad,), N, jnp.int32).at[:E].set(edge_index[1].astype(jnp.int32))
    src_col = src.reshape(e_pad, 1)
    dst_row = dst.reshape(1, e_pad)
    ea = jnp.zeros((e_pad, D), jnp.bfloat16).at[:E].set(edge_attr.astype(jnp.bfloat16))
    x_bf = x.astype(jnp.bfloat16)

    out = pl.pallas_call(
        _fused_gine_kernel,
        out_shape=jax.ShapeDtypeStruct((N, D), jnp.float32),
        grid_spec=pltpu.PrefetchScalarGridSpec(
            num_scalar_prefetch=0,
            grid=(L, num_eb),
            in_specs=[
                pl.BlockSpec((N, D), lambda l, e: (0, 0)),            # x (resident)
                pl.BlockSpec((edge_tile, 1), lambda l, e: (e, 0)),    # src indices
                pl.BlockSpec((1, edge_tile), lambda l, e: (0, e)),    # dst indices
                pl.BlockSpec((edge_tile, D), lambda l, e: (e, 0)),    # edge_attr
                pl.BlockSpec((1, D, D), lambda l, e: (l, 0, 0)),      # w_lin
                pl.BlockSpec((1, 1, D), lambda l, e: (l, 0, 0)),      # b_lin
                pl.BlockSpec((1, D, H), lambda l, e: (l, 0, 0)),      # w1 (BN folded)
                pl.BlockSpec((1, 1, H), lambda l, e: (l, 0, 0)),      # b1 (BN folded)
                pl.BlockSpec((1, H, D), lambda l, e: (l, 0, 0)),      # w2
                pl.BlockSpec((1, 1, D), lambda l, e: (l, 0, 0)),      # b2
                pl.BlockSpec(memory_space=pltpu.MemorySpace.SMEM),    # eps (L, 1)
            ],
            out_specs=pl.BlockSpec((N, D), lambda l, e: (0, 0)),
            scratch_shapes=[
                pltpu.VMEM((N, D), jnp.float32),   # h_scr: node state across layers
                pltpu.VMEM((N, D), jnp.float32),   # agg_scr: per-layer accumulator
            ],
        ),
        compiler_params=pltpu.CompilerParams(
            # Both axes carry sequential state (h_scr / agg_scr) -> 'arbitrary'.
            dimension_semantics=("arbitrary", "arbitrary"),
            vmem_limit_bytes=_VMEM_LIMIT_BYTES,
        ),
    )(x_bf, src_col, dst_row, ea,
      stacked_params["w_lin"], stacked_params["b_lin"],
      stacked_params["w1"], stacked_params["b1"],
      stacked_params["w2"], stacked_params["b2"],
      stacked_params["eps"])
    return out, pos_encoding


# ----------------------------------------------------------------------------- #
# Pure-JAX reference mirroring the kernel's mixed precision (bf16 matmul
# operands, f32 accumulation / node state), index-gather + segment_sum form.
# ----------------------------------------------------------------------------- #
def structure_extractor_reference(x, edge_index, edge_attr, sp, pos_encoding=None):
    src, dst = edge_index[0], edge_index[1]
    N = x.shape[0]
    L = sp["w_lin"].shape[0]
    bf = lambda a: a.astype(jnp.bfloat16)
    ea_bf = bf(edge_attr)
    h = x.astype(jnp.bfloat16).astype(jnp.float32)
    for l in range(L):
        e = jnp.dot(ea_bf, sp["w_lin"][l], preferred_element_type=jnp.float32) + sp["b_lin"][l]
        x_src = bf(h).astype(jnp.float32)[src]
        msg = jax.nn.relu(x_src + e)
        agg = jax.ops.segment_sum(bf(msg).astype(jnp.float32), dst, num_segments=N)
        center = agg + (1.0 + sp["eps"][l, 0]) * h
        z = jnp.dot(bf(center), sp["w1"][l], preferred_element_type=jnp.float32) + sp["b1"][l]
        z = jax.nn.relu(z)
        out = jnp.dot(bf(z), sp["w2"][l], preferred_element_type=jnp.float32) + sp["b2"][l]
        h = out + h if l > 0 else out
    return h, pos_encoding


if __name__ == "__main__":
    # Small shapes consistent with the module: embed_dim=32, 16 nodes,
    # 200 edges (-> two 128-edge tiles, exercising the accumulator), k_hop=3.
    N, E, D, K_HOP = 16, 200, 32, 3

    key = jax.random.PRNGKey(0)
    kx, ke, ks, kd, kp, kpe = jax.random.split(key, 6)

    x = jax.random.normal(kx, (N, D), dtype=jnp.float32)
    edge_attr = jax.random.normal(ke, (E, D), dtype=jnp.float32)
    src = jax.random.randint(ks, (E,), 0, N)
    dst = jax.random.randint(kd, (E,), 0, N)
    edge_index = jnp.stack([src, dst], axis=0)            # (2, E), PyG layout
    pos_enc = jax.random.normal(kpe, (N, 8), dtype=jnp.float32)

    def init_layer(k):
        kk = jax.random.split(k, 10)
        s = 0.1
        gamma = 1.0 + s * jax.random.normal(kk[4], (2 * D,), jnp.float32)
        beta = s * jax.random.normal(kk[5], (2 * D,), jnp.float32)
        run_mean = s * jax.random.normal(kk[6], (2 * D,), jnp.float32)
        run_var = jnp.abs(1.0 + s * jax.random.normal(kk[7], (2 * D,), jnp.float32))
        bn_scale = gamma / jnp.sqrt(run_var + 1e-5)
        bn_shift = beta - run_mean * bn_scale
        return {
            "w_lin": s * jax.random.normal(kk[0], (D, D), jnp.float32),
            "b_lin": s * jax.random.normal(kk[1], (1, D), jnp.float32),
            "w1":    s * jax.random.normal(kk[2], (D, 2 * D), jnp.float32),
            "b1":    s * jax.random.normal(kk[3], (1, 2 * D), jnp.float32),
            "bn_scale": bn_scale.reshape(1, 2 * D),
            "bn_shift": bn_shift.reshape(1, 2 * D),
            "w2":    s * jax.random.normal(kk[8], (2 * D, D), jnp.float32),
            "b2":    s * jax.random.normal(kk[9], (1, D), jnp.float32),
            "eps":   jnp.full((1, 1), 0.05, jnp.float32),   # GINEConv train_eps parameter
        }

    layer_params = [init_layer(k) for k in jax.random.split(kp, K_HOP)]
    sp = stack_and_fold_params(layer_params)

    h, pe = structure_extractor_forward(x, edge_index, edge_attr, sp,
                                        pos_encoding=pos_enc)
    h = jax.block_until_ready(h)

    h_ref, _ = structure_extractor_reference(x, edge_index, edge_attr, sp,
                                             pos_encoding=pos_enc)

    assert h.shape == (N, D)
    assert pe is pos_enc, "pos_encoding must be passed through unchanged"
    max_err = float(jnp.max(jnp.abs(h - h_ref)))
    # bf16 matmul operands on both sides -> only accumulation-order / rare bf16
    # rounding-boundary differences remain.
    assert jnp.allclose(h, h_ref, atol=3e-2, rtol=3e-2), f"mismatch, max_err={max_err}"

    print("KERNEL_OK")
</pallas_src>

<mosaic_0001>
module attributes {stable_mosaic.version = 11 : i64} {
  func.func @_fused_gine_kernel(%arg0: i32, %arg1: i32, %arg2: memref<16x32xbf16, #tpu.memory_space<vmem>>, %arg3: memref<128x1xi32, #tpu.memory_space<vmem>>, %arg4: memref<1x128xi32, #tpu.memory_space<vmem>>, %arg5: memref<128x32xbf16, #tpu.memory_space<vmem>>, %arg6: memref<1x32x32xbf16, #tpu.memory_space<vmem>>, %arg7: memref<1x1x32xf32, #tpu.memory_space<vmem>>, %arg8: memref<1x32x64xbf16, #tpu.memory_space<vmem>>, %arg9: memref<1x1x64xf32, #tpu.memory_space<vmem>>, %arg10: memref<1x64x32xbf16, #tpu.memory_space<vmem>>, %arg11: memref<1x1x32xf32, #tpu.memory_space<vmem>>, %arg12: memref<3x1xf32, #tpu.memory_space<smem>>, %arg13: memref<16x32xf32, #tpu.memory_space<vmem>>, %arg14: memref<16x32xf32, #tpu.memory_space<vmem>>, %arg15: memref<16x32xf32, #tpu.memory_space<vmem>>) attributes {dimension_semantics = [#tpu.dimension_semantics<arbitrary>, #tpu.dimension_semantics<arbitrary>], iteration_bounds = array<i64: 3, 2>, scalar_prefetch = 0 : i64, scratch_operands = 2 : i64, tpu.core_type = #tpu.core_type<tc>, window_params = [{pipeline_mode = #tpu.pipeline_mode<synchronous>, transform_indices = @transform_0, window_bounds = array<i64: 16, 32>}, {transform_indices = @transform_1, window_bounds = array<i64: 128, 1>}, {transform_indices = @transform_2, window_bounds = array<i64: 1, 128>}, {transform_indices = @transform_3, window_bounds = array<i64: 128, 32>}, {transform_indices = @transform_4, window_bounds = array<i64: 1, 32, 32>}, {transform_indices = @transform_5, window_bounds = array<i64: 1, 1, 32>}, {transform_indices = @transform_6, window_bounds = array<i64: 1, 32, 64>}, {transform_indices = @transform_7, window_bounds = array<i64: 1, 1, 64>}, {transform_indices = @transform_8, window_bounds = array<i64: 1, 64, 32>}, {transform_indices = @transform_9, window_bounds = array<i64: 1, 1, 32>}, {transform_indices = @transform_10, window_bounds = array<i64: 3, 1>}, {pipeline_mode = #tpu.pipeline_mode<synchronous>, transform_indices = @transform_11, window_bounds = array<i64: 16, 32>}]} {
    %c0_i32 = arith.constant 0 : i32
    %0 = arith.cmpi eq, %arg0, %c0_i32 : i32
    %c0_i32_0 = arith.constant 0 : i32
    %1 = arith.cmpi eq, %arg1, %c0_i32_0 : i32
    %2 = arith.andi %0, %1 : i1
    %3 = arith.extui %2 : i1 to i32
    %c0_i32_1 = arith.constant 0 : i32
    %4 = arith.cmpi ne, %3, %c0_i32_1 : i32
    scf.if %4 {
      %c0_31 = arith.constant 0 : index
      %c0_32 = arith.constant 0 : index
      %51 = vector.load %arg2[%c0_31, %c0_32] : memref<16x32xbf16, #tpu.memory_space<vmem>>, vector<16x32xbf16>
      %52 = arith.extf %51 : vector<16x32xbf16> to vector<16x32xf32>
      %c0_33 = arith.constant 0 : index
      %c0_34 = arith.constant 0 : index
      %53 = vector.load %arg14[%c0_33, %c0_34] : memref<16x32xf32, #tpu.memory_space<vmem>>, vector<16x32xf32>
      tpu.vector_store %arg14[%c0_33, %c0_34], %52 {strides = array<i32>} : memref<16x32xf32, #tpu.memory_space<vmem>>, vector<16x32xf32>,
    } else {
    }
    %c0_i32_2 = arith.constant 0 : i32
    %5 = arith.cmpi eq, %arg1, %c0_i32_2 : i32
    %6 = arith.extui %5 : i1 to i32
    %c0_i32_3 = arith.constant 0 : i32
    %7 = arith.cmpi ne, %6, %c0_i32_3 : i32
    scf.if %7 {
      %cst_31 = arith.constant 0.000000e+00 : f32
      %51 = vector.broadcast %cst_31 : f32 to vector<16x32xf32>
      %c0_32 = arith.constant 0 : index
      %c0_33 = arith.constant 0 : index
      %52 = vector.load %arg15[%c0_32, %c0_33] : memref<16x32xf32, #tpu.memory_space<vmem>>, vector<16x32xf32>
      tpu.vector_store %arg15[%c0_32, %c0_33], %51 {strides = array<i32>} : memref<16x32xf32, #tpu.memory_space<vmem>>, vector<16x32xf32>,
    } else {
    }
    %c0 = arith.constant 0 : index
    %c0_4 = arith.constant 0 : index
    %8 = vector.load %arg14[%c0, %c0_4] : memref<16x32xf32, #tpu.memory_space<vmem>>, vector<16x32xf32>
    %9 = arith.truncf %8 : vector<16x32xf32> to vector<16x32xbf16>
    %c0_5 = arith.constant 0 : index
    %c0_6 = arith.constant 0 : index
    %10 = vector.load %arg5[%c0_5, %c0_6] : memref<128x32xbf16, #tpu.memory_space<vmem>>, vector<128x32xbf16>
    %c0_7 = arith.constant 0 : index
    %c0_8 = arith.constant 0 : index
    %c0_9 = arith.constant 0 : index
    %11 = vector.load %arg6[%c0_7, %c0_8, %c0_9] : memref<1x32x32xbf16, #tpu.memory_space<vmem>>, vector<1x32x32xbf16>
    %12 = vector.shape_cast %11 : vector<1x32x32xbf16> to vector<32x32xbf16>
    %cst = arith.constant dense<0.000000e+00> : vector<128x32xf32>
    %13 = tpu.matmul %10, %12, %cst {dimension_numbers = #tpu.dot_dimension_numbers<[1], [0], [0], [1], [0, 0, 1, 1], [], []>} : vector<128x32xbf16>, vector<32x32xbf16>, vector<128x32xf32> -> vector<128x32xf32>
    %c0_10 = arith.constant 0 : index
    %c0_11 = arith.constant 0 : index
    %c0_12 = arith.constant 0 : index
    %14 = vector.load %arg7[%c0_10, %c0_11, %c0_12] : memref<1x1x32xf32, #tpu.memory_space<vmem>>, vector<1x1x32xf32>
    %15 = vector.shape_cast %14 : vector<1x1x32xf32> to vector<1x32xf32>
    %16 = vector.broadcast %15 : vector<1x32xf32> to vector<128x32xf32>
    %17 = arith.addf %13, %16 : vector<128x32xf32>
    %c0_13 = arith.constant 0 : index
    %c0_14 = arith.constant 0 : index
    %18 = vector.load %arg3[%c0_13, %c0_14] : memref<128x1xi32, #tpu.memory_space<vmem>>, vector<128x1xi32>
    %19 = tpu.iota {dimensions = array<i32: 1>} : vector<128x16xi32>
    %20 = vector.broadcast %18 : vector<128x1xi32> to vector<128x16xi32>
    %21 = arith.cmpi eq, %20, %19 : vector<128x16xi32>
    %cst_15 = arith.constant 1.000000e+00 : f32
    %cst_16 = arith.constant 0.000000e+00 : f32
    %22 = vector.broadcast %cst_15 : f32 to vector<128x16xf32>
    %23 = vector.broadcast %cst_16 : f32 to vector<128x16xf32>
    %24 = arith.select %21, %22, %23 : vector<128x16xi1>, vector<128x16xf32>
    %25 = arith.truncf %24 : vector<128x16xf32> to vector<128x16xbf16>
    %cst_17 = arith.constant dense<0.000000e+00> : vector<128x32xf32>
    %26 = tpu.matmul %25, %9, %cst_17 {dimension_numbers = #tpu.dot_dimension_numbers<[1], [0], [0], [1], [0, 0, 1, 1], [], []>} : vector<128x16xbf16>, vector<16x32xbf16>, vector<128x32xf32> -> vector<128x32xf32>
    %27 = arith.addf %26, %17 : vector<128x32xf32>
    %cst_18 = arith.constant 0.000000e+00 : f32
    %28 = vector.broadcast %cst_18 : f32 to vector<128x32xf32>
    %29 = arith.maximumf %27, %28 : vector<128x32xf32>
    %30 = arith.truncf %29 : vector<128x32xf32> to vector<128x32xbf16>
    %c0_19 = arith.constant 0 : index
    %c0_20 = arith.constant 0 : index
    %31 = vector.load %arg4[%c0_19, %c0_20] : memref<1x128xi32, #tpu.memory_space<vmem>>, vector<1x128xi32>
    %32 = tpu.iota {dimensions = array<i32: 0>} : vector<16x128xi32>
    %33 = vector.broadcast %31 : vector<1x128xi32> to vector<16x128xi32>
    %34 = arith.cmpi eq, %32, %33 : vector<16x128xi32>
    %cst_21 = arith.constant 1.000000e+00 : f32
    %cst_22 = arith.constant 0.000000e+00 : f32
    %35 = vector.broadcast %cst_21 : f32 to vector<16x128xf32>
    %36 = vector.broadcast %cst_22 : f32 to vector<16x128xf32>
    %37 = arith.select %34, %35, %36 : vector<16x128xi1>, vector<16x128xf32>
    %38 = arith.truncf %37 : vector<16x128xf32> to vector<16x128xbf16>
    %c0_23 = arith.constant 0 : index
    %c0_24 = arith.constant 0 : index
    %39 = vector.load %arg15[%c0_23, %c0_24] : memref<16x32xf32, #tpu.memory_space<vmem>>, vector<16x32xf32>
    %cst_25 = arith.constant dense<0.000000e+00> : vector<16x32xf32>
    %40 = tpu.matmul %38, %30, %cst_25 {dimension_numbers = #tpu.dot_dimension_numbers<[1], [0], [0], [1], [0, 0, 1, 1], [], []>} : vector<16x128xbf16>, vector<128x32xbf16>, vector<16x32xf32> -> vector<16x32xf32>
    %41 = arith.addf %39, %40 : vector<16x32xf32>
    %c0_26 = arith.constant 0 : index
    %c0_27 = arith.constant 0 : index
    %42 = vector.load %arg15[%c0_26, %c0_27] : memref<16x32xf32, #tpu.memory_space<vmem>>, vector<16x32xf32>
    tpu.vector_store %arg15[%c0_26, %c0_27], %41 {strides = array<i32>} : memref<16x32xf32, #tpu.memory_space<vmem>>, vector<16x32xf32>,
    %c1_i32 = arith.constant 1 : i32
    %43 = arith.cmpi eq, %arg1, %c1_i32 : i32
    %44 = arith.extui %43 : i1 to i32
    %c0_i32_28 = arith.constant 0 : i32
    %45 = arith.cmpi ne, %44, %c0_i32_28 : i32
    scf.if %45 {
      %c0_31 = arith.constant 0 : index
      %c0_32 = arith.constant 0 : index
      %51 = vector.load %arg14[%c0_31, %c0_32] : memref<16x32xf32, #tpu.memory_space<vmem>>, vector<16x32xf32>
      %52 = arith.index_cast %arg0 : i32 to index
      %c0_33 = arith.constant 0 : index
      %53 = memref.load %arg12[%52, %c0_33] : memref<3x1xf32, #tpu.memory_space<smem>>
      %c0_34 = arith.constant 0 : index
      %c0_35 = arith.constant 0 : index
      %54 = vector.load %arg15[%c0_34, %c0_35] : memref<16x32xf32, #tpu.memory_space<vmem>>, vector<16x32xf32>
      %cst_36 = arith.constant 1.000000e+00 : f32
      %55 = arith.addf %cst_36, %53 : f32
      %56 = vector.broadcast %55 : f32 to vector<16x32xf32>
      %57 = arith.mulf %56, %51 : vector<16x32xf32>
      %58 = arith.addf %54, %57 : vector<16x32xf32>
      %59 = arith.truncf %58 : vector<16x32xf32> to vector<16x32xbf16>
      %c0_37 = arith.constant 0 : index
      %c0_38 = arith.constant 0 : index
      %c0_39 = arith.constant 0 : index
      %60 = vector.load %arg8[%c0_37, %c0_38, %c0_39] : memref<1x32x64xbf16, #tpu.memory_space<vmem>>, vector<1x32x64xbf16>
      %61 = vector.shape_cast %60 : vector<1x32x64xbf16> to vector<32x64xbf16>
      %cst_40 = arith.constant dense<0.000000e+00> : vector<16x64xf32>
      %62 = tpu.matmul %59, %61, %cst_40 {dimension_numbers = #tpu.dot_dimension_numbers<[1], [0], [0], [1], [0, 0, 1, 1], [], []>} : vector<16x32xbf16>, vector<32x64xbf16>, vector<16x64xf32> -> vector<16x64xf32>
      %c0_41 = arith.constant 0 : index
      %c0_42 = arith.constant 0 : index
      %c0_43 = arith.constant 0 : index
      %63 = vector.load %arg9[%c0_41, %c0_42, %c0_43] : memref<1x1x64xf32, #tpu.memory_space<vmem>>, vector<1x1x64xf32>
      %64 = vector.shape_cast %63 : vector<1x1x64xf32> to vector<1x64xf32>
      %65 = vector.broadcast %64 : vector<1x64xf32> to vector<16x64xf32>
      %66 = arith.addf %62, %65 : vector<16x64xf32>
      %cst_44 = arith.constant 0.000000e+00 : f32
      %67 = vector.broadcast %cst_44 : f32 to vector<16x64xf32>
      %68 = arith.maximumf %66, %67 : vector<16x64xf32>
      %69 = arith.truncf %68 : vector<16x64xf32> to vector<16x64xbf16>
      %c0_45 = arith.constant 0 : index
      %c0_46 = arith.constant 0 : index
      %c0_47 = arith.constant 0 : index
      %70 = vector.load %arg10[%c0_45, %c0_46, %c0_47] : memref<1x64x32xbf16, #tpu.memory_space<vmem>>, vector<1x64x32xbf16>
      %71 = vector.shape_cast %70 : vector<1x64x32xbf16> to vector<64x32xbf16>
      %cst_48 = arith.constant dense<0.000000e+00> : vector<16x32xf32>
      %72 = tpu.matmul %69, %71, %cst_48 {dimension_numbers = #tpu.dot_dimension_numbers<[1], [0], [0], [1], [0, 0, 1, 1], [], []>} : vector<16x64xbf16>, vector<64x32xbf16>, vector<16x32xf32> -> vector<16x32xf32>
      %c0_49 = arith.constant 0 : index
      %c0_50 = arith.constant 0 : index
      %c0_51 = arith.constant 0 : index
      %73 = vector.load %arg11[%c0_49, %c0_50, %c0_51] : memref<1x1x32xf32, #tpu.memory_space<vmem>>, vector<1x1x32xf32>
      %74 = vector.shape_cast %73 : vector<1x1x32xf32> to vector<1x32xf32>
      %75 = vector.broadcast %74 : vector<1x32xf32> to vector<16x32xf32>
      %76 = arith.addf %72, %75 : vector<16x32xf32>
      %c0_i32_52 = arith.constant 0 : i32
      %77 = arith.cmpi sgt, %arg0, %c0_i32_52 : i32
      %cst_53 = arith.constant 1.000000e+00 : f32
      %cst_54 = arith.constant 0.000000e+00 : f32
      %78 = arith.select %77, %cst_53, %cst_54 : f32
      %79 = vector.broadcast %78 : f32 to vector<16x32xf32>
      %80 = arith.mulf %79, %51 : vector<16x32xf32>
      %81 = arith.addf %76, %80 : vector<16x32xf32>
      %c0_55 = arith.constant 0 : index
      %c0_56 = arith.constant 0 : index
      %82 = vector.load %arg14[%c0_55, %c0_56] : memref<16x32xf32, #tpu.memory_space<vmem>>, vector<16x32xf32>
      tpu.vector_store %arg14[%c0_55, %c0_56], %81 {strides = array<i32>} : memref<16x32xf32, #tpu.memory_space<vmem>>, vector<16x32xf32>,
    } else {
    }
    %c2_i32 = arith.constant 2 : i32
    %46 = arith.cmpi eq, %arg0, %c2_i32 : i32
    %c1_i32_29 = arith.constant 1 : i32
    %47 = arith.cmpi eq, %arg1, %c1_i32_29 : i32
    %48 = arith.andi %46, %47 : i1
    %49 = arith.extui %48 : i1 to i32
    %c0_i32_30 = arith.constant 0 : i32
    %50 = arith.cmpi ne, %49, %c0_i32_30 : i32
    scf.if %50 {
      %c0_31 = arith.constant 0 : index
      %c0_32 = arith.constant 0 : index
      %51 = vector.load %arg14[%c0_31, %c0_32] : memref<16x32xf32, #tpu.memory_space<vmem>>, vector<16x32xf32>
      %c0_33 = arith.constant 0 : index
      %c0_34 = arith.constant 0 : index
      %52 = vector.load %arg13[%c0_33, %c0_34] : memref<16x32xf32, #tpu.memory_space<vmem>>, vector<16x32xf32>
      tpu.vector_store %arg13[%c0_33, %c0_34], %51 {strides = array<i32>} : memref<16x32xf32, #tpu.memory_space<vmem>>, vector<16x32xf32>,
    } else {
    }
    return
  }
  func.func @transform_0(%arg0: i32, %arg1: i32) -> (i32, i32) {
    %c0_i32 = arith.constant 0 : i32
    %c0_i32_0 = arith.constant 0 : i32
    %c0_i32_1 = arith.constant 0 : i32
    return %c0_i32, %c0_i32_0 : i32, i32
  }
  func.func @transform_1(%arg0: i32, %arg1: i32) -> (i32, i32) {
    %c0_i32 = arith.constant 0 : i32
    %c0_i32_0 = arith.constant 0 : i32
    return %arg1, %c0_i32 : i32, i32
  }
  func.func @transform_2(%arg0: i32, %arg1: i32) -> (i32, i32) {
    %c0_i32 = arith.constant 0 : i32
    %c0_i32_0 = arith.constant 0 : i32
    return %c0_i32, %arg1 : i32, i32
  }
  func.func @transform_3(%arg0: i32, %arg1: i32) -> (i32, i32) {
    %c0_i32 = arith.constant 0 : i32
    %c0_i32_0 = arith.constant 0 : i32
    return %arg1, %c0_i32 : i32, i32
  }
  func.func @transform_4(%arg0: i32, %arg1: i32) -> (i32, i32, i32) {
    %c0_i32 = arith.constant 0 : i32
    %c0_i32_0 = arith.constant 0 : i32
    %c0_i32_1 = arith.constant 0 : i32
    return %arg0, %c0_i32, %c0_i32_0 : i32, i32, i32
  }
  func.func @transform_5(%arg0: i32, %arg1: i32) -> (i32, i32, i32) {
    %c0_i32 = arith.constant 0 : i32
    %c0_i32_0 = arith.constant 0 : i32
    %c0_i32_1 = arith.constant 0 : i32
    return %arg0, %c0_i32, %c0_i32_0 : i32, i32, i32
  }
  func.func @transform_6(%arg0: i32, %arg1: i32) -> (i32, i32, i32) {
    %c0_i32 = arith.constant 0 : i32
    %c0_i32_0 = arith.constant 0 : i32
    %c0_i32_1 = arith.constant 0 : i32
    return %arg0, %c0_i32, %c0_i32_0 : i32, i32, i32
  }
  func.func @transform_7(%arg0: i32, %arg1: i32) -> (i32, i32, i32) {
    %c0_i32 = arith.constant 0 : i32
    %c0_i32_0 = arith.constant 0 : i32
    %c0_i32_1 = arith.constant 0 : i32
    return %arg0, %c0_i32, %c0_i32_0 : i32, i32, i32
  }
  func.func @transform_8(%arg0: i32, %arg1: i32) -> (i32, i32, i32) {
    %c0_i32 = arith.constant 0 : i32
    %c0_i32_0 = arith.constant 0 : i32
    %c0_i32_1 = arith.constant 0 : i32
    return %arg0, %c0_i32, %c0_i32_0 : i32, i32, i32
  }
  func.func @transform_9(%arg0: i32, %arg1: i32) -> (i32, i32, i32) {
    %c0_i32 = arith.constant 0 : i32
    %c0_i32_0 = arith.constant 0 : i32
    %c0_i32_1 = arith.constant 0 : i32
    return %arg0, %c0_i32, %c0_i32_0 : i32, i32, i32
  }
  func.func @transform_10(%arg0: i32, %arg1: i32) -> (i32, i32) {
    %c0_i32 = arith.constant 0 : i32
    %c0_i32_0 = arith.constant 0 : i32
    %c0_i32_1 = arith.constant 0 : i32
    return %c0_i32, %c0_i32_0 : i32, i32
  }
  func.func @transform_11(%arg0: i32, %arg1: i32) -> (i32, i32) {
    %c0_i32 = arith.constant 0 : i32
    %c0_i32_0 = arith.constant 0 : i32
    %c0_i32_1 = arith.constant 0 : i32
    return %c0_i32, %c0_i32_0 : i32, i32
  }
}

</mosaic_0001>

<bundles_post_ra>
// kernel: tpu_custom_call.1
= control target key start
LH: loop header
LB: loop body
LE: loop exit
PB: predicated region body
PF: predicated region fallthrough
CT: control target
= control target key end

     0   :  { %s2197_s0 = inlined_call_operand.vmem [shape: bf16[16,32], index: 0, kind: input, shape index: {}]   ;;  %s2198_s1 = inlined_call_operand.vmem [shape: s32[256,1], index: 1, kind: input, shape index: {}]   ;;  %s2199_s2 = inlined_call_operand.vmem [shape: s32[1,256], index: 2, kind: input, shape index: {}]   ;;  %s2200_s3 = inlined_call_operand.vmem [shape: bf16[256,32], index: 3, kind: input, shape index: {}]   ;;  %s2201_s4 = inlined_call_operand.vmem [shape: bf16[3,32,32], index: 4, kind: input, shape index: {}]   ;;  %s2202_s5 = inlined_call_operand.vmem [shape: f32[3,1,32], index: 5, kind: input, shape index: {}]   ;;  %s2203_s6 = inlined_call_operand.vmem [shape: bf16[3,32,64], index: 6, kind: input, shape index: {}]   ;;  %s2204_s7 = inlined_call_operand.vmem [shape: f32[3,1,64], index: 7, kind: input, shape index: {}]   ;;  %s2205_s8 = inlined_call_operand.vmem [shape: bf16[3,64,32], index: 8, kind: input, shape index: {}]   ;;  %s2206_s9 = inlined_call_operand.vmem [shape: f32[3,1,32], index: 9, kind: input, shape index: {}]   ;;  %s2207_s10 = inlined_call_operand.vmem [shape: f32[3,1], index: 10, kind: input, shape index: {}]   ;;  %s2208_s11 = inlined_call_operand.hbm [shape: f32[16,32], index: 11, kind: output, shape index: {}]  }
   0x1   :  { %2213 = sst [smem:[#allocation14_spill]] %s2198_s1 }
   0x2   :  { %2214 = sst [smem:[#allocation15_spill]] %s2200_s3 }
   0x3   :  { %2215 = sst [smem:[#allocation16_spill]] %s2207_s10 }
   0x4   :  { %2216 = sst [smem:[#allocation17_spill]] %s2208_s11 }
   0x5   :  { %16 = vsyncpa [#allocation6], 0 }
   0x6   :  { %17 = vsyncpa [#allocation5], 0  ;;  %s1881_s17 = smov 0   ;;  %s1883_s18 = smov 0  }
   0x7   :  { %s1885_s19 = smov 0   ;;  %s1887_s20 = smov 0  }
   0x8   :  { %s1889_s21 = smov 0  }
   0x9 LB: > { %2217 = sst [smem:[#allocation10_spill]] %s1800_s19  ;;  %s2209_s22 = sadd.s32 4294967295, %s1808_s21   ;;  %s1808_s21 = sphi %s1889_s21, %s23_s21   ;;  %s1804_s20 = sphi %s1887_s20, %s2234_s20   ;;  %s1800_s19 = sphi %s1885_s19, %s2233_s19   ;;  %s1796_s18 = sphi %s1883_s18, %s2232_s18   ;;  %s1792_s17 = sphi %s1881_s17, %s2231_s17  }
   0xa   : > { %2218 = sst [smem:[#allocation11_spill]] %s1804_s20  ;;  %s32_s23 = sadd.s32 1, %s1800_s19 }
   0xb   : > { %p33_p0 = scmp.ge.s32.totalorder %s32_s23, 2  ;;  %s35_s24 = sadd.s32 1, %s1804_s20 }
   0xc   : > { %p1421_p1 = scmp.ge.s32.totalorder %s1808_s21, 1  ;;  %p337_p2 = scmp.lt.s32.totalorder %s1808_s21, 7 }
   0xd   : > { %s2236_s23 = smov (%p33_p0, %s32_s23), 0  ;;  %s2238_s24 = smov (!%p33_p0, %s35_s24), %s1804_s20 }
   0xe   : > { %2219 = sst [smem:[#allocation12_spill]] %s2236_s23  ;;  %p1914_p3 = pnand %p1421_p1, %p337_p2 }
   0xf   : > { %p37_p4 = scmp.ge.s32.totalorder %s2238_s24, 3  ;;  %p1920_p5 = scmp.eq.s32.totalorder %s2209_s22, 0 }
  0x10   : > { %p1644_p6 = pneg %p1914_p3  ;;  %s2222_s10 = sld [smem:[#allocation16_spill]] }
  0x11   : > { %s2240_s24 = smov (%p37_p4, %s2238_s24), 0 }
  0x12   : > { %2223 = sst [smem:[#allocation13_spill]] %s2240_s24  ;;  %p1645_p7 = pnand %p1920_p5, %p1644_p6 }
  0x14   : > { %p1723_p9 = pneg %p1645_p7 }
  0x16   : > { %s353_s29 = sshll.u32 %s2222_s10, 4  ;;  %s354_s29 = int_to_ptr.vmem [resolvable:$true] %s353_s29 }
  0x17   : > { %s1721_s30 = scalar_lea.vmem %s354_s29, 64  ;;  %p1729_p12 = scmp.lt.s32.totalorder %s354_s29, %s354_s29 }
  0x18   : > { %p1722_p8 = scmp.ne.s32.totalorder %s354_s29, %s1721_s30  ;;  %p1730_p13 = scmp.lt.s32.totalorder %s1721_s30, %s1721_s30 }
  0x1a   : > { %p1724_p10 = pnand %p1723_p9, %p1722_p8  ;;  %p1731_p0 = por %p1730_p13, %p1729_p12 }
  0x1c   : > { %p1725_p11 = pneg %p1724_p10 }
  0x1e   : > { %p1732_p1 = pnand %p1731_p0, %p1725_p11 }
  0x20   : > { %1735 = shalt.err (!%p1732_p1)
}
  0x21   : > { %s1810_s12 = smov [#allocation4]   ;;  %432 = sbr.rel (%p1914_p3) target bundleno = 1174 (0x496), region = 64 }
  0x22   : > { %1647 = dma.vmem_to_smem (!%p1645_p7), %s354_s29, 64, %s1810_s12, [#allocation6]  }
  0x28   : > { %1783 = dma.done.wait (%p1920_p5), [#allocation6], 64  }
  0x29   : > { %1785 = vsyncadd (%p1920_p5), [#allocation6], 4294967232 }
  0x2a   : > { %438 = sfence }
  0x2b   : > { %s1426_s13 = sshll.u32 %s1792_s17, 4  ;;  %p506_p2 = scmp.lt.s32.totalorder %s1792_s17, 1 }
  0x2c   : > { %p501_p4 = scmp.lt.s32.totalorder %s1426_s13, 31  ;;  %p515_p6 = scmp.lt.s32.totalorder %s1796_s18, 2 }
  0x2d   : > { %s1943_s14 = scalar_select %p506_p2, %s1792_s17, 1 }
  0x2e   : > { %s2242_s13 = smov (!%p501_p4, %s1426_s13), 31  ;;  %s2224_s1 = sld [smem:[#allocation14_spill]] }
  0x2f   : > { %s1427_s26 = sshll.u32 %s2242_s13, 3  ;;  %s1429_s27 = sshll.u32 %s2242_s13, 2 }
  0x30   : > { %s2225_s3 = sld [smem:[#allocation15_spill]]  ;;  %p540_p3 = scmp.eq.s32.totalorder %s1796_s18, 0 }
  0x31   : > { %s1960_s24 = scalar_select %p515_p6, %s1796_s18, 2 }
  0x32   : > { %p541_p5 = scmp.eq.s32.totalorder %s1792_s17, 0 }
  0x33   : > { %s1483_s13 = sshll.u32 %s1960_s24, 4  ;;  %s530_s23 = scalar_lea.vmem %s2204_s7, %s1960_s24 }
  0x34   : > { %s1952_s30 = scalar_lea.vmem %s2224_s1, %s1427_s26  ;;  %s1972_s22 = scalar_lea.vmem %s2201_s4, %s1483_s13 }
  0x35   : > { %s1977_s25 = scalar_lea.vmem %s2203_s6, %s1483_s13  ;;  %s1485_s20 = sshll.u32 %s1960_s24, 5 }
  0x36   : > { %s1957_s10 = scalar_lea.vmem %s2225_s3, %s1429_s27  ;;  %s1987_s15 = scalar_lea.vmem %s2205_s8, %s1485_s20 }
  0x37   : > { %s538_s28 = scalar_lea.vmem %s2206_s9, %s1960_s24  ;;  %p542_p7 = pnand %p541_p5, %p540_p3 }
  0x38   : > { %v1487_v0 = vld [vmem:[%s2197_s0] sm:$0xff] (!%p542_p7)   ;;  %vm550_vm0 = vcmask (!%p542_p7), 261120  }
  0x39   : > { %545 = sbr.rel (%p542_p7) target bundleno = 64 (0x40), region = 72  ;;  %v1488_v1 = vunpack.c.l.bf16 (!%p542_p7), %v1487_v0  ;;  %v1489_v2 = vunpack.c.h.bf16 (!%p542_p7), %v1487_v0 }
  0x3b   : > { %551 = vst.msk [vmem:[#allocation2] sm:$0xff] (!%p542_p7), %vm550_vm0, %v1488_v1  ;;  %552 = vst.msk [vmem:[#allocation2 + $0x8] sm:$0xff] (!%p542_p7), %vm550_vm0, %v1489_v2 }
  0x40 PF: > { %p1436_p8 = scmp.ne.s32.totalorder %s1792_s17, 0 }
  0x41   : > { %vm556_vm1 = vcmask (!%p1436_p8), 261120   ;;  %v1811_v3 = vmov (!%p1436_p8), 0.0  }
  0x42   : > { %555 = sbr.rel (%p1436_p8) target bundleno = 73 (0x49), region = 76  ;;  %557 = vst.msk [vmem:[#allocation3] sm:$0xff] (!%p1436_p8), %vm556_vm1, %v1811_v3  ;;  %558 = vst.msk [vmem:[#allocation3 + $0x8] sm:$0xff] (!%p1436_p8), %vm556_vm1, %v1811_v3 }
  0x49 PF: > { %v765_v4 = vld [vmem:[%s1952_s30 + $0x10] sm:$0xff]  ;;  %v763_v5 = vld [vmem:[%s1952_s30] sm:$0xff]  ;;  %v1812_v6 = vmov 0   ;;  %v766_v7 = vld [vmem:[%s1952_s30 + $0x18] sm:$0xff]  ;;  %vm641_vm2 = vcmask 261120   ;;  %v1813_v23 = vmov 0.0   ;;  %v779_v35 = vlaneseq  ;;  %s2227_s20 = scalar_lea.vmem %s2199_s2, %s1943_s14 }
  0x4a   : > { %1704 = vset.pattern.permute.xlu1 %v1812_v6  ;;  %1703 = vset.pattern.permute.xlu0 %v1812_v6  ;;  %v764_v8 = vld [vmem:[%s1952_s30 + $0x8] sm:$0xff]  ;;  %v767_v10 = vld [vmem:[%s1952_s30 + $0x20] sm:$0xff]  ;;  %v770_v14 = vld [vmem:[%s1952_s30 + $0x38] sm:$0xff]  ;;  %vm869_vm7 = vcmask 130048   ;;  %p1075_p9 = scmp.eq.s32.totalorder %s1792_s17, 1  ;;  %p1467_p10 = scmp.ne.s32.totalorder %s1792_s17, 1 }
  0x4b   : > { %788 = vperm.xlu1 %1704, %v765_v4   ;;  %782 = vperm.xlu0 %1703, %v763_v5   ;;  %v768_v9 = vld [vmem:[%s1952_s30 + $0x28] sm:$0xff]  ;;  %v1705_v11 = vld [vmem:[%s1972_s22] sm:$0xff]   ;;  %v769_v15 = vld [vmem:[%s1952_s30 + $0x30] sm:$0xff]  ;;  %v2033_v36 = vand.u32 127, %v779_v35  ;;  %s1468_s14 = sshll.u32 (!%p1467_p10), %s1796_s18, 7  ;;  %p1246_p11 = scmp.gt.s32.totalorder (!%p1467_p10), %s1796_s18, 0 }
  0x4c   : > { %v1706_v12 = vld [vmem:[%s1972_s22 + $0x8] sm:$0xff]   ;;  %1526 = vmatprep.subr.bf16.mxu0 %v1705_v11  ;;  %v1707_v13 = vld [vmem:[%s1957_s10] sm:$0xff]   ;;  %v1709_v20 = vld [vmem:[%s1957_s10 + $0x10] sm:$0xff]  }
  0x4d   : > { %1527 = vmatpush3.bf16.msra.mxu0 %v1705_v11  ;;  %v559_v16 = vld [vmem:[#allocation2] sm:$0xff]  ;;  %v560_v17 = vld [vmem:[#allocation2 + $0x8] sm:$0xff]  ;;  %1530 = vmatprep.mubr.msk.bf16.mxu0 %vm641_vm2, %v1707_v13  ;;  %v774_v24 = vld [vmem:[%s1952_s30 + $0x58] sm:$0xff] }
  0x4e   : > { %v561_v18 = vpack.c.bf16 %v560_v17, %v559_v16  ;;  %1528 = vmatprep.subr.bf16.mxu0 %v1706_v12  ;;  %v1708_v19 = vld [vmem:[%s1957_s10 + $0x8] sm:$0xff]   ;;  %v771_v22 = vld [vmem:[%s1952_s30 + $0x40] sm:$0xff]  ;;  %v773_v25 = vld [vmem:[%s1952_s30 + $0x50] sm:$0xff] }
  0x4f   : > { %791 = vperm.xlu1 %1704, %v766_v7   ;;  %785 = vperm.xlu0 %1703, %v764_v8   ;;  %v772_v21 = vld [vmem:[%s1952_s30 + $0x48] sm:$0xff]  ;;  %v1710_v26 = vld [vmem:[%s1957_s10 + $0x18] sm:$0xff]   ;;  %v1711_v27 = vld [vmem:[%s1957_s10 + $0x20] sm:$0xff]  }
  0x50   : > { %1546 = vmatprep.subr.bf16.mxu1 %v561_v18  ;;  %v776_v28 = vld [vmem:[%s1952_s30 + $0x68] sm:$0xff]  ;;  %v775_v29 = vld [vmem:[%s1952_s30 + $0x60] sm:$0xff]  ;;  %v778_v30 = vld [vmem:[%s1952_s30 + $0x78] sm:$0xff] }
  0x51   : > { %1529 = vmatpush3.bf16.msra.mxu0 %v1706_v12  ;;  %1547 = vmatpush3.bf16.msra.mxu1 %v561_v18  ;;  %v777_v31 = vld [vmem:[%s1952_s30 + $0x70] sm:$0xff]  ;;  %v1712_v32 = vld [vmem:[%s1957_s10 + $0x28] sm:$0xff]   ;;  %v1714_v34 = vld [vmem:[%s1957_s10 + $0x38] sm:$0xff]   ;;  %s1082_s30 = sld [smem:[#allocation4 + %s1468_s14]] (!%p1467_p10) }
  0x52   : > { %1564 = vmatprep.subr.bf16.mxu1 %v1813_v23  ;;  %v1713_v33 = vld [vmem:[%s1957_s10 + $0x30] sm:$0xff]   ;;  %s2226_s10 = scalar_lea.vmem %s2202_s5, %s1960_s24 }
  0x53   : > { %797 = vperm.xlu1 %1704, %v768_v9   ;;  %794 = vperm.xlu0 %1703, %v767_v10  }
  0x54   : > { %1531 = vmatmul.mubr.msk.bf16.vlgmr.msra.gmra.mrb[0].mxu0 %vm641_vm2, %v1708_v19 }
  0x55   : > { %1534 = vmatprep.mubr.msk.bf16.mxu0 %vm641_vm2, %v1709_v20 }
  0x57   : > { %803 = vperm.xlu1 %1704, %v770_v14   ;;  %800 = vperm.xlu0 %1703, %v769_v15   ;;  %s1085_s13 = sadd.f32 (!%p1467_p10), 1.0, %s1082_s30 }
  0x5b   : > { %809 = vperm.xlu1 %1704, %v772_v21   ;;  %806 = vperm.xlu0 %1703, %v771_v22  }
  0x5c   : > { %1535 = vmatmul.mubr.msk.bf16.gmra.mrb[4].mxu0 %vm641_vm2, %v1710_v26 }
  0x5d   : > { %1538 = vmatprep.mubr.msk.bf16.mxu0 %vm641_vm2, %v1711_v27 }
  0x5f   : > { %815 = vperm.xlu1 %1704, %v774_v24   ;;  %812 = vperm.xlu0 %1703, %v773_v25  }
  0x63   : > { %821 = vperm.xlu1 %1704, %v776_v28   ;;  %818 = vperm.xlu0 %1703, %v775_v29  }
  0x64   : > { %1539 = vmatmul.mubr.msk.bf16.gmra.mrb[8].mxu0 %vm641_vm2, %v1712_v32 }
  0x65   : > { %1542 = vmatprep.mubr.msk.bf16.mxu0 %vm641_vm2, %v1713_v33 }
  0x67   : > { %827 = vperm.xlu1 %1704, %v778_v30   ;;  %824 = vperm.xlu0 %1703, %v777_v31   ;;  %v2089_v30 = vld [vmem:[%s2226_s10] ss:$0 sm:$0xff] }
  0x6c   : > { %1543 = vmatmul.mubr.msk.bf16.gmra.mrb[12].mxu0 %vm641_vm2, %v1714_v34 }
  0xca   : > { %v789_v37 = vpop.permute.xlu1 %788  ;;  %v783_v38 = vpop.permute.xlu0 %782 }
  0xcb   : > { %vm831_vm3 = vcmp.eq.s32.totalorder %v789_v37, %v2033_v36  ;;  %vm829_vm4 = vcmp.eq.s32.totalorder %v783_v38, %v2033_v36 }
  0xcc   : > { %v847_v41 = vsel %vm831_vm3, 1.0, %v1813_v23  ;;  %v845_v42 = vsel %vm829_vm4, 1.0, %v1813_v23 }
  0xce   : > { %v792_v39 = vpop.permute.xlu1 %791  ;;  %v786_v40 = vpop.permute.xlu0 %785 }
  0xcf   : > { %vm832_vm5 = vcmp.eq.s32.totalorder %v792_v39, %v2033_v36  ;;  %vm830_vm6 = vcmp.eq.s32.totalorder %v786_v40, %v2033_v36 }
  0xd0   : > { %v848_v43 = vsel %vm832_vm5, 1.0, %v1813_v23  ;;  %v846_v44 = vsel %vm830_vm6, 1.0, %v1813_v23  ;;  %vm1814_vm5 = vmmov 0  }
  0xd1   : > { %v862_v45 = vpack.c.bf16 %v848_v43, %v847_v41  ;;  %v861_v46 = vpack.c.bf16 %v846_v44, %v845_v42 }
  0xd2   : > { %v798_v47 = vpop.permute.xlu1 %797  ;;  %v795_v48 = vpop.permute.xlu0 %794 }
  0xd3   : > { %vm834_vm8 = vcmp.eq.s32.totalorder %v798_v47, %v2033_v36  ;;  %vm833_vm9 = vcmp.eq.s32.totalorder %v795_v48, %v2033_v36  ;;  %1548 = vmatprep.mubr.msk.bf16.mxu1 %vm869_vm7, %v861_v46 }
  0xd4   : > { %v850_v49 = vsel %vm834_vm8, 1.0, %v1813_v23  ;;  %v849_v50 = vsel %vm833_vm9, 1.0, %v1813_v23  ;;  %1549 = vmatmul.mubr.msk.bf16.vlgmr.msra.gmra.mrb[0].mxu1 %vm869_vm7, %v862_v45  ;;  %vm1817_vm9 = vmmov (!%p1467_p10), 0  }
  0xd5   : > { %v863_v51 = vpack.c.bf16 %v850_v49, %v849_v50 }
  0xd6   : > { %v804_v52 = vpop.permute.xlu1 %803  ;;  %v801_v53 = vpop.permute.xlu0 %800 }
  0xd7   : > { %vm836_vm10 = vcmp.eq.s32.totalorder %v804_v52, %v2033_v36  ;;  %vm835_vm11 = vcmp.eq.s32.totalorder %v801_v53, %v2033_v36  ;;  %1552 = vmatprep.mubr.msk.bf16.mxu1 %vm869_vm7, %v863_v51 }
  0xd8   : > { %v852_v54 = vsel %vm836_vm10, 1.0, %v1813_v23  ;;  %v851_v55 = vsel %vm835_vm11, 1.0, %v1813_v23  ;;  %vm1201_vm10 = vcmask (!%p1467_p10), 523264  }
  0xd9   : > { %v864_v56 = vpack.c.bf16 %v852_v54, %v851_v55 }
  0xda   : > { %v810_v57 = vpop.permute.xlu1 %809  ;;  %v807_v58 = vpop.permute.xlu0 %806 }
  0xdb   : > { %vm838_vm12 = vcmp.eq.s32.totalorder %v810_v57, %v2033_v36  ;;  %vm837_vm13 = vcmp.eq.s32.totalorder %v807_v58, %v2033_v36 }
  0xdc   : > { %v854_v59 = vsel %vm838_vm12, 1.0, %v1813_v23  ;;  %v853_v60 = vsel %vm837_vm13, 1.0, %v1813_v23  ;;  %1553 = vmatmul.mubr.msk.bf16.gmra.mrb[4].mxu1 %vm869_vm7, %v864_v56 }
  0xdd   : > { %v865_v61 = vpack.c.bf16 %v854_v59, %v853_v60 }
  0xde   : > { %v816_v62 = vpop.permute.xlu1 %815  ;;  %v813_v63 = vpop.permute.xlu0 %812 }
  0xdf   : > { %vm840_vm14 = vcmp.eq.s32.totalorder %v816_v62, %v2033_v36  ;;  %vm839_vm15 = vcmp.eq.s32.totalorder %v813_v63, %v2033_v36  ;;  %1556 = vmatprep.mubr.msk.bf16.mxu1 %vm869_vm7, %v865_v61 }
  0xe0   : > { %v856_v0 = vsel %vm840_vm14, 1.0, %v1813_v23  ;;  %v855_v1 = vsel %vm839_vm15, 1.0, %v1813_v23 }
  0xe1   : > { %v866_v2 = vpack.c.bf16 %v856_v0, %v855_v1 }
  0xe2   : > { %v822_v3 = vpop.permute.xlu1 %821  ;;  %v819_v4 = vpop.permute.xlu0 %818 }
  0xe3   : > { %vm842_vm0 = vcmp.eq.s32.totalorder %v822_v3, %v2033_v36  ;;  %vm841_vm1 = vcmp.eq.s32.totalorder %v819_v4, %v2033_v36 }
  0xe4   : > { %v858_v5 = vsel %vm842_vm0, 1.0, %v1813_v23  ;;  %v857_v6 = vsel %vm841_vm1, 1.0, %v1813_v23  ;;  %1557 = vmatmul.mubr.msk.bf16.gmra.mrb[8].mxu1 %vm869_vm7, %v866_v2 }
  0xe5   : > { %v867_v7 = vpack.c.bf16 %v858_v5, %v857_v6 }
  0xe6   : > { %v828_v8 = vpop.permute.xlu1 %827  ;;  %v825_v9 = vpop.permute.xlu0 %824 }
  0xe7   : > { %vm844_vm3 = vcmp.eq.s32.totalorder %v828_v8, %v2033_v36  ;;  %vm843_vm4 = vcmp.eq.s32.totalorder %v825_v9, %v2033_v36  ;;  %1560 = vmatprep.mubr.msk.bf16.mxu1 %vm869_vm7, %v867_v7 }
  0xe8   : > { %v860_v10 = vsel %vm844_vm3, 1.0, %v1813_v23  ;;  %v859_v11 = vsel %vm843_vm4, 1.0, %v1813_v23 }
  0xe9   : > { %v868_v12 = vpack.c.bf16 %v860_v10, %v859_v11 }
  0xec   : > { %1561 = vmatmul.mubr.msk.bf16.gmra.mrb[12].mxu1 %vm869_vm7, %v868_v12 }
  0xed   : > { %1580 = vmatprep.mubr.msk.bf16.mxu1 %vm1814_vm5, %v1813_v23 }
 0x127   : > { %v1532_v13 = vpop.f32.mrb[0].mxu0 }
 0x128   : > { %v700_v14 = vpop.f32.mrb[1].mxu0  ;;  %v709_v31 = vadd.f32 %v1532_v13, %v2089_v30 }
 0x129   : > { %v1533_v15 = vpop.f32.mrb[2].mxu0  ;;  %v701_v32 = vadd.f32 %v2089_v30, %v700_v14 }
 0x12a   : > { %v703_v16 = vpop.f32.mrb[3].mxu0  ;;  %v712_v34 = vadd.f32 %v1533_v15, %v2089_v30 }
 0x12b   : > { %v704_v38 = vadd.f32 %v2089_v30, %v703_v16 }
 0x12f   : > { %v1536_v17 = vpop.f32.mrb[4].mxu0 }
 0x130   : > { %v716_v18 = vpop.f32.mrb[5].mxu0  ;;  %v725_v46 = vadd.f32 %v1536_v17, %v2089_v30 }
 0x131   : > { %v1537_v19 = vpop.f32.mrb[6].mxu0  ;;  %v717_v49 = vadd.f32 %v2089_v30, %v716_v18 }
 0x132   : > { %v719_v20 = vpop.f32.mrb[7].mxu0  ;;  %v728_v53 = vadd.f32 %v1537_v19, %v2089_v30 }
 0x133   : > { %v720_v56 = vadd.f32 %v2089_v30, %v719_v20 }
 0x137   : > { %v1540_v21 = vpop.f32.mrb[8].mxu0 }
 0x138   : > { %v732_v22 = vpop.f32.mrb[9].mxu0  ;;  %v741_v0 = vadd.f32 %v1540_v21, %v2089_v30 }
 0x139   : > { %v1541_v24 = vpop.f32.mrb[10].mxu0  ;;  %v733_v3 = vadd.f32 %v2089_v30, %v732_v22 }
 0x13a   : > { %v735_v25 = vpop.f32.mrb[11].mxu0  ;;  %v744_v7 = vadd.f32 %v1541_v24, %v2089_v30 }
 0x13b   : > { %v736_v10 = vadd.f32 %v2089_v30, %v735_v25 }
 0x13f   : > { %v2075_v26 = vpop.f32.mrb[12].mxu0 }
 0x140   : > { %v2077_v27 = vpop.f32.mrb[13].mxu0  ;;  %v757_v18 = vadd.f32 %v2075_v26, %v2089_v30 }
 0x141   : > { %v2079_v28 = vpop.f32.mrb[14].mxu0  ;;  %v749_v21 = vadd.f32 %v2089_v30, %v2077_v27 }
 0x142   : > { %v2081_v29 = vpop.f32.mrb[15].mxu0 }
 0x1a7   : > { %v1550_v33 = vpop.f32.mrb[0].mxu1 }
 0x1a8   : > { %v937_v36 = vadd.f32 %v1550_v33, %v709_v31  ;;  %v928_v37 = vpop.f32.mrb[1].mxu1  ;;  %v760_v31 = vadd.f32 %v2079_v28, %v2089_v30 }
 0x1a9   : > { %v929_v39 = vadd.f32 %v928_v37, %v701_v32  ;;  %v1551_v40 = vpop.f32.mrb[2].mxu1 }
 0x1aa   : > { %v940_v41 = vadd.f32 %v1551_v40, %v712_v34  ;;  %v931_v42 = vpop.f32.mrb[3].mxu1  ;;  %v993_v44 = vmax.f32 %v937_v36, 0.0  ;;  %v752_v34 = vadd.f32 %v2089_v30, %v2081_v29 }
 0x1ab   : > { %v932_v43 = vadd.f32 %v931_v42, %v704_v38  ;;  %v991_v47 = vmax.f32 %v929_v39, 0.0  ;;  %v1017_v38 = vshrl.u32 %v779_v35, 7  ;;  %v1815_v35 = vmov 1.0|1.0  }
 0x1ac   : > { %v994_v45 = vmax.f32 %v940_v41, 0.0 }
 0x1ad   : > { %v992_v48 = vmax.f32 %v932_v43, 0.0  ;;  %v1018_v29 = vadd.s32 8, %v1017_v38 }
 0x1ae   : > { %v1008_v50 = vpack.c.bf16 %v994_v45, %v993_v44  ;;  %v1464_v44 = vld [vmem:[%s2227_s20] ss:$0 sm:$0xff]  ;;  %v1028_v45 = vld [vmem:[#allocation3] sm:$0xff] }
 0x1af   : > { %v1007_v51 = vpack.c.bf16 %v992_v48, %v991_v47  ;;  %v1554_v52 = vpop.f32.mrb[4].mxu1  ;;  %vm1023_vm6 = vcmp.eq.s32.totalorder %v1017_v38, %v1464_v44  ;;  %vm1024_vm7 = vcmp.eq.s32.totalorder %v1018_v29, %v1464_v44  ;;  %v1029_v47 = vld [vmem:[#allocation3 + $0x8] sm:$0xff] }
 0x1b0   : > { %v953_v54 = vadd.f32 %v1554_v52, %v725_v46  ;;  %v944_v55 = vpop.f32.mrb[5].mxu1  ;;  %vm1465_vm8 = vmpackc.low %vm1024_vm7, %vm1023_vm6 }
 0x1b1   : > { %v945_v57 = vadd.f32 %v944_v55, %v717_v49  ;;  %v1555_v58 = vpop.f32.mrb[6].mxu1  ;;  %1565 = vmatpush3.bf16.msra.mxu1 %v1007_v51  ;;  %v1717_v55 = vld [vmem:[%s1987_s15] sm:$0xff] (!%p1467_p10)  }
 0x1b2   : > { %v956_v59 = vadd.f32 %v1555_v58, %v728_v53  ;;  %v947_v60 = vpop.f32.mrb[7].mxu1  ;;  %1566 = vmatprep.subr.bf16.mxu1 %v1813_v23  ;;  %v997_v62 = vmax.f32 %v953_v54, 0.0  ;;  %v1816_v53 = vmov (!%p1467_p10), 0.0   ;;  %v1716_v54 = vld [vmem:[%s1977_s25 + $0x8] sm:$0xff] (!%p1467_p10)  }
 0x1b3   : > { %v948_v61 = vadd.f32 %v947_v60, %v720_v56  ;;  %v995_v1 = vmax.f32 %v945_v57, 0.0  ;;  %1584 = vmatprep.subr.bf16.mxu0 (!%p1467_p10), %v1816_v53  ;;  %1588 = vmatprep.mubr.msk.bf16.mxu0 (!%p1467_p10), %vm1817_vm9, %v1816_v53  ;;  %v1718_v56 = vld [vmem:[%s1987_s15 + $0x8] sm:$0xff] (!%p1467_p10)   ;;  %v1079_v57 = vld [vmem:[#allocation2] sm:$0xff] (!%p1467_p10) }
 0x1b4   : > { %v998_v63 = vmax.f32 %v956_v59, 0.0  ;;  %v1080_v58 = vld [vmem:[#allocation2 + $0x8] sm:$0xff] (!%p1467_p10) }
 0x1b5   : > { %v996_v2 = vmax.f32 %v948_v61, 0.0  ;;  %1567 = vmatpush3.bf16.msra.mxu1 %v1008_v50  ;;  %v1086_v61 = vstv (!%p1467_p10), %s1085_s13 }
 0x1b6   : > { %v1010_v4 = vpack.c.bf16 %v998_v63, %v997_v62  ;;  %1568 = vmatprep.subr.bf16.mxu1 %v1813_v23  ;;  %v1087_v62 = vmul.f32 (!%p1467_p10), %v1086_v61, %v1079_v57  ;;  %v1088_v63 = vmul.f32 (!%p1467_p10), %v1086_v61, %v1080_v58 }
 0x1b7   : > { %v1009_v5 = vpack.c.bf16 %v996_v2, %v995_v1  ;;  %v1558_v6 = vpop.f32.mrb[8].mxu1 }
 0x1b8   : > { %v969_v8 = vadd.f32 %v1558_v6, %v741_v0  ;;  %v960_v9 = vpop.f32.mrb[9].mxu1 }
 0x1b9   : > { %v961_v11 = vadd.f32 %v960_v9, %v733_v3  ;;  %v1559_v12 = vpop.f32.mrb[10].mxu1  ;;  %1569 = vmatpush3.bf16.msra.mxu1 %v1009_v5  ;;  %v1719_v3 = vld [vmem:[%s1987_s15 + $0x10] sm:$0xff] (!%p1467_p10)   ;;  %v1469_v5 = vld [vmem:[%s530_s23] ss:$0 sm:$0xff] (!%p1467_p10) }
 0x1ba   : > { %v972_v13 = vadd.f32 %v1559_v12, %v744_v7  ;;  %v963_v14 = vpop.f32.mrb[11].mxu1  ;;  %1570 = vmatprep.subr.bf16.mxu1 %v1813_v23  ;;  %v1001_v16 = vmax.f32 %v969_v8, 0.0 }
 0x1bb   : > { %v964_v15 = vadd.f32 %v963_v14, %v736_v10  ;;  %v999_v19 = vmax.f32 %v961_v11, 0.0 }
 0x1bc   : > { %v1002_v17 = vmax.f32 %v972_v13, 0.0 }
 0x1bd   : > { %v1000_v20 = vmax.f32 %v964_v15, 0.0  ;;  %1571 = vmatpush3.bf16.msra.mxu1 %v1010_v4  ;;  %v1720_v4 = vld [vmem:[%s1987_s15 + $0x18] sm:$0xff] (!%p1467_p10)  }
 0x1be   : > { %v1012_v22 = vpack.c.bf16 %v1002_v17, %v1001_v16  ;;  %1572 = vmatprep.subr.bf16.mxu1 %v1813_v23  ;;  %v1473_v16 = vld [vmem:[%s538_s28] ss:$0 sm:$0xff] (!%p1467_p10) }
 0x1bf   : > { %v1011_v24 = vpack.c.bf16 %v1000_v20, %v999_v19  ;;  %v1562_v25 = vpop.f32.mrb[12].mxu1 }
 0x1c0   : > { %v985_v32 = vadd.f32 %v1562_v25, %v757_v18  ;;  %v976_v33 = vpop.f32.mrb[13].mxu1 }
 0x1c1   : > { %v977_v26 = vadd.f32 %v976_v33, %v749_v21  ;;  %v1563_v36 = vpop.f32.mrb[14].mxu1  ;;  %1573 = vmatpush3.bf16.msra.mxu1 %v1011_v24 }
 0x1c2   : > { %v988_v37 = vadd.f32 %v1563_v36, %v760_v31  ;;  %v979_v27 = vpop.f32.mrb[15].mxu1  ;;  %1574 = vmatprep.subr.bf16.mxu1 %v1813_v23  ;;  %v1005_v40 = vmax.f32 %v985_v32, 0.0 }
 0x1c3   : > { %v980_v39 = vadd.f32 %v979_v27, %v752_v34  ;;  %v1003_v42 = vmax.f32 %v977_v26, 0.0 }
 0x1c4   : > { %v1006_v41 = vmax.f32 %v988_v37, 0.0 }
 0x1c5   : > { %v1004_v28 = vmax.f32 %v980_v39, 0.0  ;;  %1575 = vmatpush3.bf16.msra.mxu1 %v1012_v22 }
 0x1c6   : > { %v1014_v43 = vpack.c.bf16 %v1006_v41, %v1005_v40  ;;  %1576 = vmatprep.subr.bf16.mxu1 %v1813_v23 }
 0x1c7   : > { %v1013_v30 = vpack.c.bf16 %v1004_v28, %v1003_v42 }
 0x1c9   : > { %1577 = vmatpush3.bf16.msra.mxu1 %v1013_v30 }
 0x1ca   : > { %1578 = vmatprep.subr.bf16.mxu1 %v1813_v23  ;;  %v1715_v23 = vld [vmem:[%s1977_s25] sm:$0xff] (!%p1467_p10)  }
 0x1cb   : > { %1585 = vmatpush3.bf16.msra.mxu0 (!%p1467_p10), %v1715_v23 }
 0x1cc   : > { %1586 = vmatprep.subr.bf16.mxu0 (!%p1467_p10), %v1816_v53 }
 0x1cd   : > { %1579 = vmatpush3.bf16.msra.mxu1 %v1014_v43 }
 0x1ce   : > { %1592 = vmatprep.subr.bf16.mxu1 (!%p1467_p10), %v1816_v53 }
 0x1cf   : > { %1587 = vmatpush3.bf16.msra.mxu0 (!%p1467_p10), %v1716_v54 }
 0x1d0   : > { %1581 = vmatmul.mubr.msk.bf16.vlgmr.msra.gmra.mrb[16].mxu1 %vm1465_vm8, %v1815_v35 }
 0x1d1   : > { %1600 = vmatprep.mubr.msk.bf16.mxu1 (!%p1467_p10), %vm1817_vm9, %v1816_v53  ;;  %1593 = vmatpush3.bf16.msra.mxu1 (!%p1467_p10), %v1717_v55 }
 0x1d2   : > { %1594 = vmatprep.subr.bf16.mxu1 (!%p1467_p10), %v1816_v53 }
 0x1d5   : > { %1595 = vmatpush3.bf16.msra.mxu1 (!%p1467_p10), %v1718_v56 }
 0x1d6   : > { %1596 = vmatprep.subr.bf16.mxu1 (!%p1467_p10), %v1816_v53 }
 0x1d9   : > { %1597 = vmatpush3.bf16.msra.mxu1 (!%p1467_p10), %v1719_v3 }
 0x1da   : > { %1598 = vmatprep.subr.bf16.mxu1 (!%p1467_p10), %v1816_v53 }
 0x1dd   : > { %1599 = vmatpush3.bf16.msra.mxu1 (!%p1467_p10), %v1720_v4 }
 0x2a2   : > { %1078 = sbr.rel (%p1467_p10) target bundleno = 1131 (0x46b), region = 80 }
 0x2a3   : > { %v1064_v46 = vpop.f32.mrb[16].mxu1 }
 0x2a4   : > { %v1071_v48 = vadd.f32 %v1064_v46, %v1028_v45  ;;  %v1582_v49 = vpop.f32.mrb[17].mxu1 }
 0x2a5   : > { %v1067_v50 = vpop.f32.mrb[18].mxu1 }
 0x2a6   : > { %1073 = vst.msk [vmem:[#allocation3] sm:$0xff] %vm641_vm2, %v1071_v48  ;;  %v1072_v51 = vadd.f32 %v1067_v50, %v1029_v47  ;;  %v1583_v52 = vpop.f32.mrb[19].mxu1 }
 0x2a8   : > { %1074 = vst.msk [vmem:[#allocation3 + $0x8] sm:$0xff] %vm641_vm2, %v1072_v51 }
 0x2a9   : > { %s1247_s22 = scalar_select %p1246_p11, 1.0, 0.0 }
 0x2ab   : > { %v1248_v15 = vstv %s1247_s22 }
 0x2ac   : > { %v1249_v17 = vmul.f32 %v1248_v15, %v1079_v57  ;;  %v1250_v21 = vmul.f32 %v1248_v15, %v1080_v58 }
 0x2ad   : > { %v1083_v59 = vld [vmem:[#allocation3] sm:$0xff] }
 0x2ae   : > { %v1089_v0 = vadd.f32 %v1087_v62, %v1083_v59 }
 0x2af   : > { %v1084_v60 = vld [vmem:[#allocation3 + $0x8] sm:$0xff] }
 0x2b0   : > { %v1090_v1 = vadd.f32 %v1088_v63, %v1084_v60 }
 0x2b2   : > { %v1091_v2 = vpack.c.bf16 %v1090_v1, %v1089_v0 }
 0x2b4   : > { %1589 = vmatmul.mubr.msk.bf16.vlgmr.msra.gmra.mrb[0].mxu0 %vm641_vm2, %v1091_v2 }
 0x387   : > { %v1152_v6 = vpop.f32.mrb[0].mxu0 }
 0x388   : > { %v1153_v7 = vadd.f32 %v1469_v5, %v1152_v6  ;;  %v1590_v8 = vpop.f32.mrb[1].mxu0 }
 0x389   : > { %v1155_v9 = vpop.f32.mrb[2].mxu0 }
 0x38a   : > { %v1156_v10 = vadd.f32 %v1469_v5, %v1155_v9  ;;  %v1591_v11 = vpop.f32.mrb[3].mxu0  ;;  %v1159_v12 = vmax.f32 %v1153_v7, 0.0 }
 0x38c   : > { %v1160_v13 = vmax.f32 %v1156_v10, 0.0 }
 0x38e   : > { %v1161_v14 = vpack.c.bf16 %v1160_v13, %v1159_v12 }
 0x390   : > { %1601 = vmatmul.mubr.msk.bf16.vlgmr.msra.gmra.mrb[0].mxu1 %vm1201_vm10, %v1161_v14 }
 0x463   : > { %v1239_v18 = vpop.f32.mrb[0].mxu1 }
 0x464   : > { %v1240_v19 = vadd.f32 %v1473_v16, %v1239_v18  ;;  %v1602_v20 = vpop.f32.mrb[1].mxu1 }
 0x465   : > { %v1242_v22 = vpop.f32.mrb[2].mxu1 }
 0x466   : > { %v1251_v24 = vadd.f32 %v1249_v17, %v1240_v19  ;;  %v1243_v25 = vadd.f32 %v1473_v16, %v1242_v22  ;;  %v1603_v31 = vpop.f32.mrb[3].mxu1 }
 0x468   : > { %1253 = vst.msk [vmem:[#allocation2] sm:$0xff] %vm641_vm2, %v1251_v24  ;;  %v1252_v32 = vadd.f32 %v1250_v21, %v1243_v25 }
 0x46a   : > { %1254 = vst.msk [vmem:[#allocation2 + $0x8] sm:$0xff] %vm641_vm2, %v1252_v32 }
 0x46b PF: > { %p1255_p12 = scmp.eq.s32.totalorder %s1796_s18, 2 }
 0x46d   : > { %p1256_p13 = pnand %p1255_p12, %p1075_p9 }
 0x46f   : > { %1259 = sbr.rel (%p1256_p13) target bundleno = 1142 (0x476), region = 84  ;;  %v1260_v33 = vld [vmem:[#allocation2] sm:$0xff] (!%p1256_p13) }
 0x470   : > { %1262 = vst.msk [vmem:[#allocation7] sm:$0xff] (!%p1256_p13), %vm641_vm2, %v1260_v33 }
 0x471   : > { %v1261_v34 = vld [vmem:[#allocation2 + $0x8] sm:$0xff] (!%p1256_p13) }
 0x472   : > { %1263 = vst.msk [vmem:[#allocation7 + $0x8] sm:$0xff] (!%p1256_p13), %vm641_vm2, %v1261_v34 }
 0x476 PF: > { %s2228_s23 = sadd.s32 4294967295, %s1808_s21   ;;  %s1818_s16 = smov [#allocation7]  }
 0x477   : > { %p2156_p0 = scmp.eq.s32.totalorder %s2228_s23, 5  ;;  %s1270_s28 = sshll.u32 %s1818_s16, 4  ;;  %s1271_s28 = int_to_ptr.vmem [resolvable:$true] %s1270_s28 }
 0x478   : > { %s1736_s17 = scalar_lea.vmem %s1271_s28, 256  ;;  %p1743_p6 = scmp.lt.s32.totalorder %s1271_s28, %s1271_s28 }
 0x479   : > { %p1737_p1 = scmp.ne.s32.totalorder %s1271_s28, %s1736_s17  ;;  %p1744_p3 = scmp.lt.s32.totalorder %s1736_s17, %s1736_s17 }
 0x47b   : > { %p1738_p2 = pnand %p1737_p1, %p2156_p0  ;;  %p1745_p5 = por %p1744_p3, %p1743_p6 }
 0x47d   : > { %p1739_p4 = pneg %p1738_p2 }
 0x47f   : > { %p1746_p7 = pnand %p1745_p5, %p1739_p4 }
 0x481   : > { %1749 = shalt.err (!%p1746_p7)
}
 0x482   : > { %s2230_s27 = sld [smem:[#allocation17_spill]] }
 0x488   : > { %s1750_s1 = scalar_lea.hbm %s2230_s27, 256 }
 0x489   : > { %p1751_p8 = scmp.ne.s32.totalorder %s2230_s27, %s1750_s1  ;;  %p1756_p11 = scmp.lt.u32.totalorder %s1750_s1, %s2230_s27 }
 0x48b   : > { %p1752_p9 = pnand %p1751_p8, %p2156_p0 }
 0x48d   : > { %p1753_p10 = pneg %p1752_p9 }
 0x48f   : > { %p1758_p12 = pnand %p1756_p11, %p1753_p10 }
 0x491   : > { %1761 = shalt.err (!%p1758_p12)
}
 0x492   : > { %s1819_s20 = smov 128   ;;  %s1820_s14 = smov 8  }
 0x493   : > { %1641 = dma.vmem_to_hbm [thread:$0]  (%p2156_p0), %s1271_s28, 256, %s2230_s27, [#allocation5], %s1819_s20, %s1819_s20, %s1820_s14  }
 0x494   : > { %1787 = dma.done.wait (%p2156_p0), [#allocation5], 256  }
 0x495   : > { %1789 = vsyncadd (%p2156_p0), [#allocation5], 4294967040 }
 0x496 PF: > { %s23_s21 = sadd.s32 1, %s1808_s21   ;;  %s2231_s17 = sld [smem:[#allocation10_spill]] }
 0x497   : > { %p20_p13 = scmp.ge.s32.totalorder %s23_s21, 8   ;;  %s2232_s18 = sld [smem:[#allocation11_spill]] }
 0x498   : > { %s2233_s19 = sld [smem:[#allocation12_spill]]  ;;  %s2234_s20 = sld [smem:[#allocation13_spill]] }
 0x499   :  { %22 = sbr.rel (!%p20_p13) target bundleno = 9 (0x9), region = 136 }
 0x4a0   :  { %1286 = vsyncpa [#allocation5], 1 }
 0x4a1   :  { %1288 = vsyncpa [#allocation5 + $0x1], 1 }
 0x4a2   :  { %1289 = vsyncpa [#allocation6], 1 }
 0x4a3   :  { %1291 = vsyncpa [#allocation6 + $0x1], 1 }

</bundles_post_ra>
